<compile_context>
chip_gen: v7x
topology: tpu7x:2x2x1
jax: 0.10.0
libtpu: 0.0.40
codegen_flags: <defaults>
</compile_context>

<pallas_src>
import jax
import jax.numpy as jnp
from jax import lax
from jax.experimental import pallas as pl
from jax.experimental.pallas import tpu as pltpu


def make_lstm_tagger_kernel(seq_len: int, batch: int):
    """Kernel closure over the static sequence length N and batch B."""
    N, B = seq_len, batch

    def kernel(sent_ref, emb_tab_ref, w_ih_ref, w_hh_ref, b_ref,
               w_out_ref, b_out_ref, out_ref, xproj_ref, h_all_ref):
        # sent_ref    : (N*B, 1) int32   VMEM  time-major token ids (row = t*B + b)
        # emb_tab_ref : (V, E)    float32 VMEM  embedding table
        # w_ih_ref    : (E, 4H)   float32 VMEM  input weights, gate order [i,f,g,o]
        # w_hh_ref    : (H, 4H)   float32 VMEM  recurrent weights
        # b_ref       : (1, 4H)   float32 VMEM  b_ih + b_hh
        # w_out_ref   : (H, T)    float32 VMEM
        # b_out_ref   : (1, T)    float32 VMEM
        # out_ref     : (N*B, T)  float32 VMEM  time-major log-probs
        # xproj_ref   : (N*B, 4H) float32 VMEM scratch (hoisted input projection)
        # h_all_ref   : (N*B, H)  float32 VMEM scratch (all hidden states)
        V = emb_tab_ref.shape[0]
        H = w_hh_ref.shape[0]
        NB = N * B

        # ---- Embedding gather fused with the input projection ----------------
        # table_proj[v] = emb_tab[v] @ w_ih; token rows are then selected with
        # a one-hot matmul, so the whole prologue is two MXU matmuls and one
        # full-width store -- no scalar-address-dependent narrow gathers.
        table_proj = jnp.dot(emb_tab_ref[...], w_ih_ref[...],
                             preferred_element_type=jnp.float32)        # (V, 4H)
        tok = sent_ref[...]                                             # (NB, 1)
        onehot = (lax.broadcasted_iota(jnp.int32, (NB, V), 1)
                  == tok).astype(jnp.float32)                           # (NB, V)
        xproj_ref[...] = (jnp.dot(onehot, table_proj,
                                  preferred_element_type=jnp.float32)
                          + b_ref[...])                                 # (NB, 4H)

        # ---- LSTM recurrence, fully unrolled (N static & small) --------------
        # For much larger N, switch to lax.fori_loop(..., unroll=True) to keep
        # code size and vreg live ranges bounded; at N=8 unrolling is fine.
        w_hh = w_hh_ref[...]                     # load once, reuse every step
        h = jnp.zeros((B, H), jnp.float32)
        c = jnp.zeros((B, H), jnp.float32)
        for t in range(N):
            # Static-offset, sublane-aligned (B, 4H) load from VMEM scratch:
            # issued ahead of the matmul result, off the serial h->gates chain.
            gates = xproj_ref[pl.ds(t * B, B), :] + jnp.dot(
                h, w_hh, preferred_element_type=jnp.float32)            # (B, 4H)
            # Activate the whole 4H-lane gate tensor (2 EUP passes), then slice.
            sig = jax.nn.sigmoid(gates)
            tnh = jnp.tanh(gates)
            i_g = sig[:, 0 * H:1 * H]
            f_g = sig[:, 1 * H:2 * H]
            g_g = tnh[:, 2 * H:3 * H]
            o_g = sig[:, 3 * H:4 * H]
            c = f_g * c + i_g * g_g
            h = o_g * jnp.tanh(c)
            # Static-index store; not a dependency of the next iteration.
            h_all_ref[pl.ds(t * B, B), :] = h

        # ---- Tag projection + log_softmax, one batched store ------------------
        tags = (jnp.dot(h_all_ref[...], w_out_ref[...],
                        preferred_element_type=jnp.float32)
                + b_out_ref[...])                                       # (NB, T)
        m = jnp.max(tags, axis=1, keepdims=True)
        lse = m + jnp.log(jnp.sum(jnp.exp(tags - m), axis=1, keepdims=True))
        out_ref[...] = tags - lse

    return kernel


def lstm_tagger_forward_batched(sentences, emb_tab, w_ih, w_hh, b, w_out, b_out):
    """B independent sentences of equal length N -> (B, N, T) log-probs."""
    B, N = sentences.shape
    H = w_hh.shape[0]
    T = w_out.shape[1]
    # Time-major flattening: row t*B + b holds sentence b's token t, so every
    # per-step slice inside the kernel is a contiguous, sublane-aligned block.
    sent_flat = sentences.astype(jnp.int32).T.reshape(N * B, 1)

    out_flat = pl.pallas_call(
        make_lstm_tagger_kernel(N, B),
        out_shape=jax.ShapeDtypeStruct((N * B, T), jnp.float32),
        in_specs=[pl.BlockSpec(memory_space=pltpu.MemorySpace.VMEM)] * 7,
        out_specs=pl.BlockSpec(memory_space=pltpu.MemorySpace.VMEM),
        scratch_shapes=[pltpu.VMEM((N * B, 4 * H), jnp.float32),
                        pltpu.VMEM((N * B, H), jnp.float32)],
    )(sent_flat, emb_tab, w_ih, w_hh, b, w_out, b_out)
    return out_flat.reshape(N, B, T).transpose(1, 0, 2)                 # (B, N, T)


def lstm_tagger_forward(sentence, emb_tab, w_ih, w_hh, b, w_out, b_out):
    """Single-sentence forward matching the PyTorch module: (N,) -> (N, T)."""
    return lstm_tagger_forward_batched(sentence[None, :], emb_tab, w_ih, w_hh,
                                       b, w_out, b_out)[0]


def reference_forward(sentence, emb_tab, w_ih, w_hh, b, w_out, b_out):
    """Pure-JAX reference mirroring torch.nn.LSTM semantics (batch=1, h0=c0=0)."""
    H = w_hh.shape[0]
    embeddings = jnp.take(emb_tab, sentence, axis=0)   # (N, E)

    def step(carry, x):
        h, c = carry
        gates = x[None, :] @ w_ih + h @ w_hh + b       # (1, 4H)
        i_g = jax.nn.sigmoid(gates[:, 0 * H:1 * H])
        f_g = jax.nn.sigmoid(gates[:, 1 * H:2 * H])
        g_g = jnp.tanh(gates[:, 2 * H:3 * H])
        o_g = jax.nn.sigmoid(gates[:, 3 * H:4 * H])
        c_new = f_g * c + i_g * g_g
        h_new = o_g * jnp.tanh(c_new)
        return (h_new, c_new), h_new[0]

    h0 = jnp.zeros((1, H), jnp.float32)
    c0 = jnp.zeros((1, H), jnp.float32)
    _, hs = lax.scan(step, (h0, c0), embeddings)       # (N, H)
    tags = hs @ w_out + b_out                          # (N, T)
    return jax.nn.log_softmax(tags, axis=1)


if __name__ == "__main__":
    # Small, deterministic configuration consistent with the module's __init__.
    embedding_dim = 32     # E
    hidden_dim = 32        # H
    wordspace_size = 50    # vocab
    tagspace_size = 8      # T
    seq_len = 8            # N
    batch = 8              # B (throughput path; module interface is B=1)

    key = jax.random.PRNGKey(0)
    (k_emb, k_wih, k_whh, k_bih, k_bhh, k_wout, k_bout,
     k_sent, k_batch) = jax.random.split(key, 9)

    scale = 1.0 / jnp.sqrt(hidden_dim)
    emb_tab = jax.random.normal(k_emb, (wordspace_size, embedding_dim), jnp.float32)
    # PyTorch nn.LSTM stores weight_ih_l0 as (4H, E); we pre-transpose to (E, 4H).
    w_ih = jax.random.uniform(k_wih, (embedding_dim, 4 * hidden_dim),
                              jnp.float32, -scale, scale)
    w_hh = jax.random.uniform(k_whh, (hidden_dim, 4 * hidden_dim),
                              jnp.float32, -scale, scale)
    b_ih = jax.random.uniform(k_bih, (1, 4 * hidden_dim), jnp.float32, -scale, scale)
    b_hh = jax.random.uniform(k_bhh, (1, 4 * hidden_dim), jnp.float32, -scale, scale)
    b = b_ih + b_hh
    w_out = jax.random.uniform(k_wout, (hidden_dim, tagspace_size),
                               jnp.float32, -scale, scale)
    b_out = jax.random.uniform(k_bout, (1, tagspace_size), jnp.float32, -scale, scale)

    # ---- Single sentence: exact module semantics (N,) -> (N, T) --------------
    sentence = jax.random.randint(k_sent, (seq_len,), 0, wordspace_size, jnp.int32)
    out = lstm_tagger_forward(sentence, emb_tab, w_ih, w_hh, b, w_out, b_out)
    out = jax.block_until_ready(out)
    ref = reference_forward(sentence, emb_tab, w_ih, w_hh, b, w_out, b_out)
    assert out.shape == (seq_len, tagspace_size)
    assert jnp.allclose(out, ref, atol=1e-4), "Pallas output mismatch vs JAX reference"

    # ---- Batched throughput path: B sentences per kernel call ----------------
    sentences = jax.random.randint(k_batch, (batch, seq_len), 0,
                                   wordspace_size, jnp.int32)
    out_b = lstm_tagger_forward_batched(sentences, emb_tab, w_ih, w_hh, b,
                                        w_out, b_out)
    out_b = jax.block_until_ready(out_b)
    ref_b = jax.vmap(
        lambda s: reference_forward(s, emb_tab, w_ih, w_hh, b, w_out, b_out)
    )(sentences)
    assert out_b.shape == (batch, seq_len, tagspace_size)
    assert jnp.allclose(out_b, ref_b, atol=1e-4), "Batched Pallas output mismatch"

    print("KERNEL_OK")
</pallas_src>

<mosaic_0001>
module attributes {stable_mosaic.version = 11 : i64} {
  func.func @kernel(%arg0: memref<8x1xi32, #tpu.memory_space<vmem>>, %arg1: memref<50x32xf32, #tpu.memory_space<vmem>>, %arg2: memref<32x128xf32, #tpu.memory_space<vmem>>, %arg3: memref<32x128xf32, #tpu.memory_space<vmem>>, %arg4: memref<1x128xf32, #tpu.memory_space<vmem>>, %arg5: memref<32x8xf32, #tpu.memory_space<vmem>>, %arg6: memref<1x8xf32, #tpu.memory_space<vmem>>, %arg7: memref<8x8xf32, #tpu.memory_space<vmem>>, %arg8: memref<8x128xf32, #tpu.memory_space<vmem>>, %arg9: memref<8x32xf32, #tpu.memory_space<vmem>>) attributes {dimension_semantics = [], scalar_prefetch = 0 : i64, scratch_operands = 2 : i64, tpu.core_type = #tpu.core_type<tc>} {
    %c0 = arith.constant 0 : index
    %c0_0 = arith.constant 0 : index
    %0 = vector.load %arg1[%c0, %c0_0] : memref<50x32xf32, #tpu.memory_space<vmem>>, vector<50x32xf32>
    %c0_1 = arith.constant 0 : index
    %c0_2 = arith.constant 0 : index
    %1 = vector.load %arg2[%c0_1, %c0_2] : memref<32x128xf32, #tpu.memory_space<vmem>>, vector<32x128xf32>
    %cst = arith.constant dense<0.000000e+00> : vector<50x128xf32>
    %2 = tpu.matmul %0, %1, %cst {dimension_numbers = #tpu.dot_dimension_numbers<[1], [0], [0], [1], [0, 0, 1, 1], [], []>} : vector<50x32xf32>, vector<32x128xf32>, vector<50x128xf32> -> vector<50x128xf32>
    %c0_3 = arith.constant 0 : index
    %c0_4 = arith.constant 0 : index
    %3 = vector.load %arg0[%c0_3, %c0_4] : memref<8x1xi32, #tpu.memory_space<vmem>>, vector<8x1xi32>
    %4 = tpu.iota {dimensions = array<i32: 1>} : vector<8x50xi32>
    %5 = vector.broadcast %3 : vector<8x1xi32> to vector<8x50xi32>
    %6 = arith.cmpi eq, %4, %5 : vector<8x50xi32>
    %7 = arith.extui %6 : vector<8x50xi1> to vector<8x50xi32>
    %8 = arith.sitofp %7 : vector<8x50xi32> to vector<8x50xf32>
    %cst_5 = arith.constant dense<0.000000e+00> : vector<8x128xf32>
    %9 = tpu.matmul %8, %2, %cst_5 {dimension_numbers = #tpu.dot_dimension_numbers<[1], [0], [0], [1], [0, 0, 1, 1], [], []>} : vector<8x50xf32>, vector<50x128xf32>, vector<8x128xf32> -> vector<8x128xf32>
    %c0_6 = arith.constant 0 : index
    %c0_7 = arith.constant 0 : index
    %10 = vector.load %arg4[%c0_6, %c0_7] : memref<1x128xf32, #tpu.memory_space<vmem>>, vector<1x128xf32>
    %11 = vector.broadcast %10 : vector<1x128xf32> to vector<8x128xf32>
    %12 = arith.addf %9, %11 : vector<8x128xf32>
    %c0_8 = arith.constant 0 : index
    %c0_9 = arith.constant 0 : index
    %13 = vector.load %arg8[%c0_8, %c0_9] : memref<8x128xf32, #tpu.memory_space<vmem>>, vector<8x128xf32>
    tpu.vector_store %arg8[%c0_8, %c0_9], %12 {strides = array<i32>} : memref<8x128xf32, #tpu.memory_space<vmem>>, vector<8x128xf32>,
    %c0_10 = arith.constant 0 : index
    %c0_11 = arith.constant 0 : index
    %14 = vector.load %arg3[%c0_10, %c0_11] : memref<32x128xf32, #tpu.memory_space<vmem>>, vector<32x128xf32>
    %cst_12 = arith.constant 0.000000e+00 : f32
    %15 = vector.broadcast %cst_12 : f32 to vector<1x32xf32>
    %cst_13 = arith.constant 0.000000e+00 : f32
    %16 = vector.broadcast %cst_13 : f32 to vector<1x32xf32>
    %c0_14 = arith.constant 0 : index
    %c0_15 = arith.constant 0 : index
    %17 = vector.load %arg8[%c0_14, %c0_15] : memref<8x128xf32, #tpu.memory_space<vmem>>, vector<1x128xf32>
    %cst_16 = arith.constant dense<0.000000e+00> : vector<1x128xf32>
    %18 = tpu.matmul %15, %14, %cst_16 {dimension_numbers = #tpu.dot_dimension_numbers<[1], [0], [0], [1], [0, 0, 1, 1], [], []>} : vector<1x32xf32>, vector<32x128xf32>, vector<1x128xf32> -> vector<1x128xf32>
    %19 = arith.addf %17, %18 : vector<1x128xf32>
    %20 = arith.negf %19 : vector<1x128xf32>
    %21 = math.exp %20 : vector<1x128xf32>
    %cst_17 = arith.constant 1.000000e+00 : f32
    %22 = vector.broadcast %cst_17 : f32 to vector<1x128xf32>
    %23 = arith.addf %22, %21 : vector<1x128xf32>
    %24 = arith.divf %22, %23 : vector<1x128xf32>
    %25 = math.tanh %19 : vector<1x128xf32>
    %26 = vector.extract_strided_slice %24 {offsets = [0, 0], sizes = [1, 32], strides = [1, 1]} : vector<1x128xf32> to vector<1x32xf32>
    %27 = vector.extract_strided_slice %24 {offsets = [0, 32], sizes = [1, 32], strides = [1, 1]} : vector<1x128xf32> to vector<1x32xf32>
    %28 = vector.extract_strided_slice %25 {offsets = [0, 64], sizes = [1, 32], strides = [1, 1]} : vector<1x128xf32> to vector<1x32xf32>
    %29 = vector.extract_strided_slice %24 {offsets = [0, 96], sizes = [1, 32], strides = [1, 1]} : vector<1x128xf32> to vector<1x32xf32>
    %30 = arith.mulf %27, %16 : vector<1x32xf32>
    %31 = arith.mulf %26, %28 : vector<1x32xf32>
    %32 = arith.addf %30, %31 : vector<1x32xf32>
    %33 = math.tanh %32 : vector<1x32xf32>
    %34 = arith.mulf %29, %33 : vector<1x32xf32>
    %c0_18 = arith.constant 0 : index
    %c0_19 = arith.constant 0 : index
    %35 = vector.load %arg9[%c0_18, %c0_19] : memref<8x32xf32, #tpu.memory_space<vmem>>, vector<1x32xf32>
    tpu.vector_store %arg9[%c0_18, %c0_19], %34 {strides = array<i32>} : memref<8x32xf32, #tpu.memory_space<vmem>>, vector<1x32xf32>,
    %c1 = arith.constant 1 : index
    %c0_20 = arith.constant 0 : index
    %36 = vector.load %arg8[%c1, %c0_20] : memref<8x128xf32, #tpu.memory_space<vmem>>, vector<1x128xf32>
    %cst_21 = arith.constant dense<0.000000e+00> : vector<1x128xf32>
    %37 = tpu.matmul %34, %14, %cst_21 {dimension_numbers = #tpu.dot_dimension_numbers<[1], [0], [0], [1], [0, 0, 1, 1], [], []>} : vector<1x32xf32>, vector<32x128xf32>, vector<1x128xf32> -> vector<1x128xf32>
    %38 = arith.addf %36, %37 : vector<1x128xf32>
    %39 = arith.negf %38 : vector<1x128xf32>
    %40 = math.exp %39 : vector<1x128xf32>
    %cst_22 = arith.constant 1.000000e+00 : f32
    %41 = vector.broadcast %cst_22 : f32 to vector<1x128xf32>
    %42 = arith.addf %41, %40 : vector<1x128xf32>
    %43 = arith.divf %41, %42 : vector<1x128xf32>
    %44 = math.tanh %38 : vector<1x128xf32>
    %45 = vector.extract_strided_slice %43 {offsets = [0, 0], sizes = [1, 32], strides = [1, 1]} : vector<1x128xf32> to vector<1x32xf32>
    %46 = vector.extract_strided_slice %43 {offsets = [0, 32], sizes = [1, 32], strides = [1, 1]} : vector<1x128xf32> to vector<1x32xf32>
    %47 = vector.extract_strided_slice %44 {offsets = [0, 64], sizes = [1, 32], strides = [1, 1]} : vector<1x128xf32> to vector<1x32xf32>
    %48 = vector.extract_strided_slice %43 {offsets = [0, 96], sizes = [1, 32], strides = [1, 1]} : vector<1x128xf32> to vector<1x32xf32>
    %49 = arith.mulf %46, %32 : vector<1x32xf32>
    %50 = arith.mulf %45, %47 : vector<1x32xf32>
    %51 = arith.addf %49, %50 : vector<1x32xf32>
    %52 = math.tanh %51 : vector<1x32xf32>
    %53 = arith.mulf %48, %52 : vector<1x32xf32>
    %c1_23 = arith.constant 1 : index
    %c0_24 = arith.constant 0 : index
    %54 = vector.load %arg9[%c1_23, %c0_24] : memref<8x32xf32, #tpu.memory_space<vmem>>, vector<1x32xf32>
    tpu.vector_store %arg9[%c1_23, %c0_24], %53 {strides = array<i32>} : memref<8x32xf32, #tpu.memory_space<vmem>>, vector<1x32xf32>,
    %c2 = arith.constant 2 : index
    %c0_25 = arith.constant 0 : index
    %55 = vector.load %arg8[%c2, %c0_25] : memref<8x128xf32, #tpu.memory_space<vmem>>, vector<1x128xf32>
    %cst_26 = arith.constant dense<0.000000e+00> : vector<1x128xf32>
    %56 = tpu.matmul %53, %14, %cst_26 {dimension_numbers = #tpu.dot_dimension_numbers<[1], [0], [0], [1], [0, 0, 1, 1], [], []>} : vector<1x32xf32>, vector<32x128xf32>, vector<1x128xf32> -> vector<1x128xf32>
    %57 = arith.addf %55, %56 : vector<1x128xf32>
    %58 = arith.negf %57 : vector<1x128xf32>
    %59 = math.exp %58 : vector<1x128xf32>
    %cst_27 = arith.constant 1.000000e+00 : f32
    %60 = vector.broadcast %cst_27 : f32 to vector<1x128xf32>
    %61 = arith.addf %60, %59 : vector<1x128xf32>
    %62 = arith.divf %60, %61 : vector<1x128xf32>
    %63 = math.tanh %57 : vector<1x128xf32>
    %64 = vector.extract_strided_slice %62 {offsets = [0, 0], sizes = [1, 32], strides = [1, 1]} : vector<1x128xf32> to vector<1x32xf32>
    %65 = vector.extract_strided_slice %62 {offsets = [0, 32], sizes = [1, 32], strides = [1, 1]} : vector<1x128xf32> to vector<1x32xf32>
    %66 = vector.extract_strided_slice %63 {offsets = [0, 64], sizes = [1, 32], strides = [1, 1]} : vector<1x128xf32> to vector<1x32xf32>
    %67 = vector.extract_strided_slice %62 {offsets = [0, 96], sizes = [1, 32], strides = [1, 1]} : vector<1x128xf32> to vector<1x32xf32>
    %68 = arith.mulf %65, %51 : vector<1x32xf32>
    %69 = arith.mulf %64, %66 : vector<1x32xf32>
    %70 = arith.addf %68, %69 : vector<1x32xf32>
    %71 = math.tanh %70 : vector<1x32xf32>
    %72 = arith.mulf %67, %71 : vector<1x32xf32>
    %c2_28 = arith.constant 2 : index
    %c0_29 = arith.constant 0 : index
    %73 = vector.load %arg9[%c2_28, %c0_29] : memref<8x32xf32, #tpu.memory_space<vmem>>, vector<1x32xf32>
    tpu.vector_store %arg9[%c2_28, %c0_29], %72 {strides = array<i32>} : memref<8x32xf32, #tpu.memory_space<vmem>>, vector<1x32xf32>,
    %c3 = arith.constant 3 : index
    %c0_30 = arith.constant 0 : index
    %74 = vector.load %arg8[%c3, %c0_30] : memref<8x128xf32, #tpu.memory_space<vmem>>, vector<1x128xf32>
    %cst_31 = arith.constant dense<0.000000e+00> : vector<1x128xf32>
    %75 = tpu.matmul %72, %14, %cst_31 {dimension_numbers = #tpu.dot_dimension_numbers<[1], [0], [0], [1], [0, 0, 1, 1], [], []>} : vector<1x32xf32>, vector<32x128xf32>, vector<1x128xf32> -> vector<1x128xf32>
    %76 = arith.addf %74, %75 : vector<1x128xf32>
    %77 = arith.negf %76 : vector<1x128xf32>
    %78 = math.exp %77 : vector<1x128xf32>
    %cst_32 = arith.constant 1.000000e+00 : f32
    %79 = vector.broadcast %cst_32 : f32 to vector<1x128xf32>
    %80 = arith.addf %79, %78 : vector<1x128xf32>
    %81 = arith.divf %79, %80 : vector<1x128xf32>
    %82 = math.tanh %76 : vector<1x128xf32>
    %83 = vector.extract_strided_slice %81 {offsets = [0, 0], sizes = [1, 32], strides = [1, 1]} : vector<1x128xf32> to vector<1x32xf32>
    %84 = vector.extract_strided_slice %81 {offsets = [0, 32], sizes = [1, 32], strides = [1, 1]} : vector<1x128xf32> to vector<1x32xf32>
    %85 = vector.extract_strided_slice %82 {offsets = [0, 64], sizes = [1, 32], strides = [1, 1]} : vector<1x128xf32> to vector<1x32xf32>
    %86 = vector.extract_strided_slice %81 {offsets = [0, 96], sizes = [1, 32], strides = [1, 1]} : vector<1x128xf32> to vector<1x32xf32>
    %87 = arith.mulf %84, %70 : vector<1x32xf32>
    %88 = arith.mulf %83, %85 : vector<1x32xf32>
    %89 = arith.addf %87, %88 : vector<1x32xf32>
    %90 = math.tanh %89 : vector<1x32xf32>
    %91 = arith.mulf %86, %90 : vector<1x32xf32>
    %c3_33 = arith.constant 3 : index
    %c0_34 = arith.constant 0 : index
    %92 = vector.load %arg9[%c3_33, %c0_34] : memref<8x32xf32, #tpu.memory_space<vmem>>, vector<1x32xf32>
    tpu.vector_store %arg9[%c3_33, %c0_34], %91 {strides = array<i32>} : memref<8x32xf32, #tpu.memory_space<vmem>>, vector<1x32xf32>,
    %c4 = arith.constant 4 : index
    %c0_35 = arith.constant 0 : index
    %93 = vector.load %arg8[%c4, %c0_35] : memref<8x128xf32, #tpu.memory_space<vmem>>, vector<1x128xf32>
    %cst_36 = arith.constant dense<0.000000e+00> : vector<1x128xf32>
    %94 = tpu.matmul %91, %14, %cst_36 {dimension_numbers = #tpu.dot_dimension_numbers<[1], [0], [0], [1], [0, 0, 1, 1], [], []>} : vector<1x32xf32>, vector<32x128xf32>, vector<1x128xf32> -> vector<1x128xf32>
    %95 = arith.addf %93, %94 : vector<1x128xf32>
    %96 = arith.negf %95 : vector<1x128xf32>
    %97 = math.exp %96 : vector<1x128xf32>
    %cst_37 = arith.constant 1.000000e+00 : f32
    %98 = vector.broadcast %cst_37 : f32 to vector<1x128xf32>
    %99 = arith.addf %98, %97 : vector<1x128xf32>
    %100 = arith.divf %98, %99 : vector<1x128xf32>
    %101 = math.tanh %95 : vector<1x128xf32>
    %102 = vector.extract_strided_slice %100 {offsets = [0, 0], sizes = [1, 32], strides = [1, 1]} : vector<1x128xf32> to vector<1x32xf32>
    %103 = vector.extract_strided_slice %100 {offsets = [0, 32], sizes = [1, 32], strides = [1, 1]} : vector<1x128xf32> to vector<1x32xf32>
    %104 = vector.extract_strided_slice %101 {offsets = [0, 64], sizes = [1, 32], strides = [1, 1]} : vector<1x128xf32> to vector<1x32xf32>
    %105 = vector.extract_strided_slice %100 {offsets = [0, 96], sizes = [1, 32], strides = [1, 1]} : vector<1x128xf32> to vector<1x32xf32>
    %106 = arith.mulf %103, %89 : vector<1x32xf32>
    %107 = arith.mulf %102, %104 : vector<1x32xf32>
    %108 = arith.addf %106, %107 : vector<1x32xf32>
    %109 = math.tanh %108 : vector<1x32xf32>
    %110 = arith.mulf %105, %109 : vector<1x32xf32>
    %c4_38 = arith.constant 4 : index
    %c0_39 = arith.constant 0 : index
    %111 = vector.load %arg9[%c4_38, %c0_39] : memref<8x32xf32, #tpu.memory_space<vmem>>, vector<1x32xf32>
    tpu.vector_store %arg9[%c4_38, %c0_39], %110 {strides = array<i32>} : memref<8x32xf32, #tpu.memory_space<vmem>>, vector<1x32xf32>,
    %c5 = arith.constant 5 : index
    %c0_40 = arith.constant 0 : index
    %112 = vector.load %arg8[%c5, %c0_40] : memref<8x128xf32, #tpu.memory_space<vmem>>, vector<1x128xf32>
    %cst_41 = arith.constant dense<0.000000e+00> : vector<1x128xf32>
    %113 = tpu.matmul %110, %14, %cst_41 {dimension_numbers = #tpu.dot_dimension_numbers<[1], [0], [0], [1], [0, 0, 1, 1], [], []>} : vector<1x32xf32>, vector<32x128xf32>, vector<1x128xf32> -> vector<1x128xf32>
    %114 = arith.addf %112, %113 : vector<1x128xf32>
    %115 = arith.negf %114 : vector<1x128xf32>
    %116 = math.exp %115 : vector<1x128xf32>
    %cst_42 = arith.constant 1.000000e+00 : f32
    %117 = vector.broadcast %cst_42 : f32 to vector<1x128xf32>
    %118 = arith.addf %117, %116 : vector<1x128xf32>
    %119 = arith.divf %117, %118 : vector<1x128xf32>
    %120 = math.tanh %114 : vector<1x128xf32>
    %121 = vector.extract_strided_slice %119 {offsets = [0, 0], sizes = [1, 32], strides = [1, 1]} : vector<1x128xf32> to vector<1x32xf32>
    %122 = vector.extract_strided_slice %119 {offsets = [0, 32], sizes = [1, 32], strides = [1, 1]} : vector<1x128xf32> to vector<1x32xf32>
    %123 = vector.extract_strided_slice %120 {offsets = [0, 64], sizes = [1, 32], strides = [1, 1]} : vector<1x128xf32> to vector<1x32xf32>
    %124 = vector.extract_strided_slice %119 {offsets = [0, 96], sizes = [1, 32], strides = [1, 1]} : vector<1x128xf32> to vector<1x32xf32>
    %125 = arith.mulf %122, %108 : vector<1x32xf32>
    %126 = arith.mulf %121, %123 : vector<1x32xf32>
    %127 = arith.addf %125, %126 : vector<1x32xf32>
    %128 = math.tanh %127 : vector<1x32xf32>
    %129 = arith.mulf %124, %128 : vector<1x32xf32>
    %c5_43 = arith.constant 5 : index
    %c0_44 = arith.constant 0 : index
    %130 = vector.load %arg9[%c5_43, %c0_44] : memref<8x32xf32, #tpu.memory_space<vmem>>, vector<1x32xf32>
    tpu.vector_store %arg9[%c5_43, %c0_44], %129 {strides = array<i32>} : memref<8x32xf32, #tpu.memory_space<vmem>>, vector<1x32xf32>,
    %c6 = arith.constant 6 : index
    %c0_45 = arith.constant 0 : index
    %131 = vector.load %arg8[%c6, %c0_45] : memref<8x128xf32, #tpu.memory_space<vmem>>, vector<1x128xf32>
    %cst_46 = arith.constant dense<0.000000e+00> : vector<1x128xf32>
    %132 = tpu.matmul %129, %14, %cst_46 {dimension_numbers = #tpu.dot_dimension_numbers<[1], [0], [0], [1], [0, 0, 1, 1], [], []>} : vector<1x32xf32>, vector<32x128xf32>, vector<1x128xf32> -> vector<1x128xf32>
    %133 = arith.addf %131, %132 : vector<1x128xf32>
    %134 = arith.negf %133 : vector<1x128xf32>
    %135 = math.exp %134 : vector<1x128xf32>
    %cst_47 = arith.constant 1.000000e+00 : f32
    %136 = vector.broadcast %cst_47 : f32 to vector<1x128xf32>
    %137 = arith.addf %136, %135 : vector<1x128xf32>
    %138 = arith.divf %136, %137 : vector<1x128xf32>
    %139 = math.tanh %133 : vector<1x128xf32>
    %140 = vector.extract_strided_slice %138 {offsets = [0, 0], sizes = [1, 32], strides = [1, 1]} : vector<1x128xf32> to vector<1x32xf32>
    %141 = vector.extract_strided_slice %138 {offsets = [0, 32], sizes = [1, 32], strides = [1, 1]} : vector<1x128xf32> to vector<1x32xf32>
    %142 = vector.extract_strided_slice %139 {offsets = [0, 64], sizes = [1, 32], strides = [1, 1]} : vector<1x128xf32> to vector<1x32xf32>
    %143 = vector.extract_strided_slice %138 {offsets = [0, 96], sizes = [1, 32], strides = [1, 1]} : vector<1x128xf32> to vector<1x32xf32>
    %144 = arith.mulf %141, %127 : vector<1x32xf32>
    %145 = arith.mulf %140, %142 : vector<1x32xf32>
    %146 = arith.addf %144, %145 : vector<1x32xf32>
    %147 = math.tanh %146 : vector<1x32xf32>
    %148 = arith.mulf %143, %147 : vector<1x32xf32>
    %c6_48 = arith.constant 6 : index
    %c0_49 = arith.constant 0 : index
    %149 = vector.load %arg9[%c6_48, %c0_49] : memref<8x32xf32, #tpu.memory_space<vmem>>, vector<1x32xf32>
    tpu.vector_store %arg9[%c6_48, %c0_49], %148 {strides = array<i32>} : memref<8x32xf32, #tpu.memory_space<vmem>>, vector<1x32xf32>,
    %c7 = arith.constant 7 : index
    %c0_50 = arith.constant 0 : index
    %150 = vector.load %arg8[%c7, %c0_50] : memref<8x128xf32, #tpu.memory_space<vmem>>, vector<1x128xf32>
    %cst_51 = arith.constant dense<0.000000e+00> : vector<1x128xf32>
    %151 = tpu.matmul %148, %14, %cst_51 {dimension_numbers = #tpu.dot_dimension_numbers<[1], [0], [0], [1], [0, 0, 1, 1], [], []>} : vector<1x32xf32>, vector<32x128xf32>, vector<1x128xf32> -> vector<1x128xf32>
    %152 = arith.addf %150, %151 : vector<1x128xf32>
    %153 = arith.negf %152 : vector<1x128xf32>
    %154 = math.exp %153 : vector<1x128xf32>
    %cst_52 = arith.constant 1.000000e+00 : f32
    %155 = vector.broadcast %cst_52 : f32 to vector<1x128xf32>
    %156 = arith.addf %155, %154 : vector<1x128xf32>
    %157 = arith.divf %155, %156 : vector<1x128xf32>
    %158 = math.tanh %152 : vector<1x128xf32>
    %159 = vector.extract_strided_slice %157 {offsets = [0, 0], sizes = [1, 32], strides = [1, 1]} : vector<1x128xf32> to vector<1x32xf32>
    %160 = vector.extract_strided_slice %157 {offsets = [0, 32], sizes = [1, 32], strides = [1, 1]} : vector<1x128xf32> to vector<1x32xf32>
    %161 = vector.extract_strided_slice %158 {offsets = [0, 64], sizes = [1, 32], strides = [1, 1]} : vector<1x128xf32> to vector<1x32xf32>
    %162 = vector.extract_strided_slice %157 {offsets = [0, 96], sizes = [1, 32], strides = [1, 1]} : vector<1x128xf32> to vector<1x32xf32>
    %163 = arith.mulf %160, %146 : vector<1x32xf32>
    %164 = arith.mulf %159, %161 : vector<1x32xf32>
    %165 = arith.addf %163, %164 : vector<1x32xf32>
    %166 = math.tanh %165 : vector<1x32xf32>
    %167 = arith.mulf %162, %166 : vector<1x32xf32>
    %c7_53 = arith.constant 7 : index
    %c0_54 = arith.constant 0 : index
    %168 = vector.load %arg9[%c7_53, %c0_54] : memref<8x32xf32, #tpu.memory_space<vmem>>, vector<1x32xf32>
    tpu.vector_store %arg9[%c7_53, %c0_54], %167 {strides = array<i32>} : memref<8x32xf32, #tpu.memory_space<vmem>>, vector<1x32xf32>,
    %c0_55 = arith.constant 0 : index
    %c0_56 = arith.constant 0 : index
    %169 = vector.load %arg9[%c0_55, %c0_56] : memref<8x32xf32, #tpu.memory_space<vmem>>, vector<8x32xf32>
    %c0_57 = arith.constant 0 : index
    %c0_58 = arith.constant 0 : index
    %170 = vector.load %arg5[%c0_57, %c0_58] : memref<32x8xf32, #tpu.memory_space<vmem>>, vector<32x8xf32>
    %cst_59 = arith.constant dense<0.000000e+00> : vector<8x8xf32>
    %171 = tpu.matmul %169, %170, %cst_59 {dimension_numbers = #tpu.dot_dimension_numbers<[1], [0], [0], [1], [0, 0, 1, 1], [], []>} : vector<8x32xf32>, vector<32x8xf32>, vector<8x8xf32> -> vector<8x8xf32>
    %c0_60 = arith.constant 0 : index
    %c0_61 = arith.constant 0 : index
    %172 = vector.load %arg6[%c0_60, %c0_61] : memref<1x8xf32, #tpu.memory_space<vmem>>, vector<1x8xf32>
    %173 = vector.broadcast %172 : vector<1x8xf32> to vector<8x8xf32>
    %174 = arith.addf %171, %173 : vector<8x8xf32>
    %cst_62 = arith.constant dense<0xFF800000> : vector<8xf32>
    %175 = vector.multi_reduction <maximumf>, %174, %cst_62 [1] : vector<8x8xf32> to vector<8xf32>
    %176 = vector.shape_cast %175 : vector<8xf32> to vector<8x1xf32>
    %177 = vector.broadcast %176 : vector<8x1xf32> to vector<8x8xf32>
    %178 = arith.subf %174, %177 : vector<8x8xf32>
    %179 = math.exp %178 : vector<8x8xf32>
    %cst_63 = arith.constant dense<0.000000e+00> : vector<8xf32>
    %180 = vector.multi_reduction <add>, %179, %cst_63 [1] : vector<8x8xf32> to vector<8xf32>
    %181 = vector.shape_cast %180 : vector<8xf32> to vector<8x1xf32>
    %182 = math.log %181 : vector<8x1xf32>
    %183 = arith.addf %176, %182 : vector<8x1xf32>
    %184 = vector.broadcast %183 : vector<8x1xf32> to vector<8x8xf32>
    %185 = arith.subf %174, %184 : vector<8x8xf32>
    %c0_64 = arith.constant 0 : index
    %c0_65 = arith.constant 0 : index
    %186 = vector.load %arg7[%c0_64, %c0_65] : memref<8x8xf32, #tpu.memory_space<vmem>>, vector<8x8xf32>
    tpu.vector_store %arg7[%c0_64, %c0_65], %185 {strides = array<i32>} : memref<8x8xf32, #tpu.memory_space<vmem>>, vector<8x8xf32>,
    return
  }
}

</mosaic_0001>

<bundles_post_ra>
// kernel: tpu_custom_call.1
= control target key start
LH: loop header
LB: loop body
LE: loop exit
PB: predicated region body
PF: predicated region fallthrough
CT: control target
= control target key end

     0   :  { %v1605_v3 = vmov 0.0|0.0   ;;  %vm1606_vm0 = vmmov 0   ;;  %v1607_v6 = vmov 0.0   ;;  %v1608_v7 = vmov 0   ;;  %s1868_s0 = inlined_call_operand.vmem [shape: s32[8,1], index: 0, kind: input, shape index: {}]   ;;  %s1869_s1 = inlined_call_operand.vmem [shape: f32[50,32], index: 1, kind: input, shape index: {}]   ;;  %s1870_s2 = inlined_call_operand.vmem [shape: f32[32,128], index: 2, kind: input, shape index: {}]   ;;  %s1871_s3 = inlined_call_operand.vmem [shape: f32[32,128], index: 3, kind: input, shape index: {}]   ;;  %s1872_s4 = inlined_call_operand.vmem [shape: f32[1,128], index: 4, kind: input, shape index: {}]   ;;  %s1873_s5 = inlined_call_operand.vmem [shape: f32[32,8], index: 5, kind: input, shape index: {}]   ;;  %s1874_s6 = inlined_call_operand.vmem [shape: f32[1,8], index: 6, kind: input, shape index: {}]   ;;  %s1875_s7 = inlined_call_operand.hbm [shape: f32[8,8], index: 7, kind: output, shape index: {}]  }
   0x1   :  { %v34_v0 = vld [vmem:[%s1870_s2] sm:$0xff]  ;;  %v35_v1 = vld [vmem:[%s1870_s2 + $0x8] sm:$0xff]  ;;  %v36_v2 = vld [vmem:[%s1870_s2 + $0x10] sm:$0xff]  ;;  %1436 = vmatprep.subr.bf16.mxu0 %v1605_v3  ;;  %1299 = vmatprep.mubr.msk.f32.mxu0 %vm1606_vm0, %v1607_v6 }
   0x2   :  { %v1437_v4 = vpack.c.bf16 %v35_v1, %v34_v0  ;;  %v37_v5 = vld [vmem:[%s1870_s2 + $0x18] sm:$0xff]  ;;  %1512 = vset.pattern.permute.xlu0 %v1608_v7  ;;  %1442 = vmatprep.subr.bf16.mxu1 %v1605_v3  ;;  %v160_v9 = vld [vmem:[%s1868_s0] sm:$0xff] }
   0x3   :  { %v1440_v8 = vpack.c.bf16 %v37_v5, %v36_v2  ;;  %1334 = vmatprep.mubr.msk.f32.mxu1 %vm1606_vm0, %v1607_v6  ;;  %164 = vperm.xlu0 %1512, %v160_v9  }
   0x4   :  { %1438 = vmatpush3.bf16.msra.mxu0 %v1437_v4 }
   0x5   :  { %1439 = vmatprep.subr.bf16.mxu0 %v1605_v3 }
   0x6   :  { %12 = vsyncpa [#allocation5], 0  ;;  %v27_v10 = vld [vmem:[%s1869_s1] sm:$0xff]  ;;  %vm38_vm1 = vcmask 261120   ;;  %v28_v11 = vld [vmem:[%s1869_s1 + $0x8] sm:$0xff]  ;;  %v161_v33 = vlaneseq  ;;  %vm180_vm3 = vcmask 1041408  }
   0x7   :  { %v29_v12 = vld [vmem:[%s1869_s1 + $0x10] sm:$0xff]  ;;  %v30_v13 = vld [vmem:[%s1869_s1 + $0x18] sm:$0xff]  ;;  %v31_v14 = vld [vmem:[%s1869_s1 + $0x20] sm:$0xff]  ;;  %vm176_vm4 = vcmask 408576   ;;  %s1609_s8 = smov 64   ;;  %vm362_vm5 = vcmask 253952  }
   0x8   :  { %1441 = vmatpush3.bf16.msra.mxu0 %v1440_v8  ;;  %v32_v15 = vld [vmem:[%s1869_s1 + $0x28] sm:$0xff]  ;;  %v33_v16 = vld [vmem:[%s1869_s1 + $0x30] sm:$0x3]  ;;  %v255_v17 = vld [vmem:[%s1871_s3] sm:$0xff]  ;;  %v162_v36 = vand.u32 127, %v161_v33  ;;  %vm1170_vm6 = vcmask 64512  }
   0x9   :  { %1463 = vmatprep.subr.bf16.mxu0 %v1605_v3  ;;  %v256_v18 = vld [vmem:[%s1871_s3 + $0x8] sm:$0xff]  ;;  %v257_v20 = vld [vmem:[%s1871_s3 + $0x10] sm:$0xff]  ;;  %v258_v21 = vld [vmem:[%s1871_s3 + $0x18] sm:$0xff] }
   0xa   :  { %v1723_v19 = vpack.c.bf16 %v256_v18, %v255_v17  ;;  %v1733_v22 = vpack.c.bf16 %v258_v21, %v257_v20  ;;  %v1207_v44 = vld [vmem:[%s1872_s4] ss:$0 sm:$0xff]  ;;  %s1610_s4 = smov 32  }
   0xb   :  { %1300 = vmatmul.mubr.msk.f32.vlgmr.msra.gmra.mrb[0].mxu0 %vm38_vm1, %v27_v10 }
   0xc   :  { %1302 = vmatprep.mubr.msk.f32.mxu0 %vm1606_vm0, %v1607_v6  ;;  %1465 = vmatpush3.bf16.msra.mxu0 %v1723_v19 }
   0xd   :  { %1466 = vmatprep.subr.bf16.mxu0 %v1605_v3 }
   0xf   :  { %1303 = vmatmul.mubr.msk.f32.gmra.mrb[2].mxu0 %vm38_vm1, %v28_v11 }
  0x10   :  { %1305 = vmatprep.mubr.msk.f32.mxu0 %vm1606_vm0, %v1607_v6  ;;  %1468 = vmatpush3.bf16.msra.mxu0 %v1733_v22 }
  0x11   :  { %1475 = vmatprep.subr.bf16.mxu0 %v1605_v3 }
  0x13   :  { %1306 = vmatmul.mubr.msk.f32.gmra.mrb[4].mxu0 %vm38_vm1, %v29_v12 }
  0x14   :  { %1308 = vmatprep.mubr.msk.f32.mxu0 %vm1606_vm0, %v1607_v6 }
  0x17   :  { %1309 = vmatmul.mubr.msk.f32.gmra.mrb[6].mxu0 %vm38_vm1, %v30_v13 }
  0x18   :  { %1311 = vmatprep.mubr.msk.f32.mxu0 %vm1606_vm0, %v1607_v6 }
  0x1b   :  { %1312 = vmatmul.mubr.msk.f32.gmra.mrb[8].mxu0 %vm38_vm1, %v31_v14 }
  0x1c   :  { %1314 = vmatprep.mubr.msk.f32.mxu0 %vm1606_vm0, %v1607_v6 }
  0x1f   :  { %1315 = vmatmul.mubr.msk.f32.gmra.mrb[10].mxu0 %vm38_vm1, %v32_v15 }
  0x20   :  { %1317 = vmatprep.mubr.msk.f32.mxu0 %vm1606_vm0, %v1607_v6 }
  0x23   :  { %1318 = vmatmul.mubr.msk.f32.gmra.mrb[12].mxu0 %vm38_vm1, %v33_v16 }
  0x24   :  { %1367 = vmatprep.mubr.msk.f32.mxu0 %vm1606_vm0, %v1607_v6 }
  0x82   :  { %v165_v37 = vpop.permute.xlu0 %164 }
  0x83   :  { %vm166_vm2 = vcmp.eq.s32.totalorder %v162_v36, %v165_v37 }
  0x84   :  { %v1206_v42 = vsel %vm166_vm2, 1.0, %v1607_v6 }
  0xde   :  { %v126_v23 = vpop.f32.mrb[0].mxu0 }
  0xdf   :  { %v1301_v24 = vpop.f32.mrb[1].mxu0 }
  0xe2   :  { %v131_v25 = vpop.f32.mrb[2].mxu0 }
  0xe3   :  { %v1443_v26 = vpack.c.bf16 %v131_v25, %v126_v23  ;;  %v1304_v27 = vpop.f32.mrb[3].mxu0 }
  0xe5   :  { %1444 = vmatpush3.bf16.msra.mxu1 %v1443_v26 }
  0xe6   :  { %v136_v28 = vpop.f32.mrb[4].mxu0  ;;  %1445 = vmatprep.subr.bf16.mxu1 %v1605_v3 }
  0xe7   :  { %v1307_v29 = vpop.f32.mrb[5].mxu0 }
  0xea   :  { %v141_v30 = vpop.f32.mrb[6].mxu0 }
  0xeb   :  { %v1446_v31 = vpack.c.bf16 %v141_v30, %v136_v28  ;;  %v1310_v32 = vpop.f32.mrb[7].mxu0 }
  0xed   :  { %1447 = vmatpush3.bf16.msra.mxu1 %v1446_v31 }
  0xee   :  { %v146_v34 = vpop.f32.mrb[8].mxu0  ;;  %1448 = vmatprep.subr.bf16.mxu1 %v1605_v3 }
  0xef   :  { %v1313_v35 = vpop.f32.mrb[9].mxu0 }
  0xf2   :  { %v151_v38 = vpop.f32.mrb[10].mxu0 }
  0xf3   :  { %v1449_v39 = vpack.c.bf16 %v151_v38, %v146_v34  ;;  %v1316_v40 = vpop.f32.mrb[11].mxu0 }
  0xf5   :  { %1450 = vmatpush3.bf16.msra.mxu1 %v1449_v39 }
  0xf6   :  { %v156_v41 = vpop.f32.mrb[12].mxu0  ;;  %1332 = vmatprep.subr.mxu1 %v1607_v6 }
  0xf7   :  { %v1319_v43 = vpop.f32.mrb[13].mxu0 }
  0xf9   :  { %1333 = vmatpush3.msk.msra.mxu1 %vm180_vm3, %v156_v41 }
  0xfa   :  { %1335 = vmatmul.mubr.msk.f32.vlgmr.msra.gmra.mrb[0].mxu1 %vm176_vm4, %v1206_v42  ;;  %1451 = vmatprep.subr.bf16.mxu1 %v1605_v3 }
  0xfb   :  { %1453 = vmatpush3.bf16.msra.mxu1 %v1723_v19  ;;  %1345 = vmatprep.mubr.msk.f32.mxu1 %vm1606_vm0, %v1607_v6 }
  0xfc   :  { %1454 = vmatprep.subr.bf16.mxu1 %v1605_v3 }
  0xff   :  { %1456 = vmatpush3.bf16.msra.mxu1 %v1733_v22 }
 0x100   :  { %1457 = vmatprep.subr.bf16.mxu1 %v1605_v3 }
 0x102   :  { %1346 = vmatmul.mubr.f32.vlgmr.msra.gmra.mrb[2].mxu1 %v1607_v6 }
 0x103   :  { %1459 = vmatpush3.bf16.msra.mxu1 %v1723_v19  ;;  %1356 = vmatprep.mubr.msk.f32.mxu1 %vm1606_vm0, %v1607_v6 }
 0x104   :  { %1460 = vmatprep.subr.bf16.mxu1 %v1605_v3 }
 0x107   :  { %1462 = vmatpush3.bf16.msra.mxu1 %v1733_v22 }
 0x108   :  { %1469 = vmatprep.subr.bf16.mxu1 %v1605_v3 }
 0x1cd   :  { %v250_v45 = vpop.f32.mrb[0].mxu1 }
 0x1ce   :  { %v251_v46 = vadd.f32 %v1207_v44, %v250_v45  ;;  %v1336_v47 = vpop.f32.mrb[1].mxu1 }
 0x1d0   :  { %254 = vst [vmem:[#allocation2] sm:$0xff] %v251_v46 }
 0x1d5   :  { %v329_v48 = vpop.f32.mrb[2].mxu1 }
 0x1d6   :  { %v1347_v49 = vpop.f32.mrb[3].mxu1 }
 0x1d7   :  { %v259_v50 = vld [vmem:[#allocation2] sm:$0x1]  ;;  %v364_v2 = vld [vmem:[#allocation2 + $0x1] sm:$0x1]  ;;  %v467_v24 = vld [vmem:[#allocation2 + $0x2] sm:$0x1] }
 0x1d8   :  { %v333_v51 = vadd.f32 %v329_v48, %v259_v50  ;;  %v570_v42 = vld [vmem:[#allocation2 + $0x3] sm:$0x1] }
 0x1da   :  { %1513 = vtanh.f32 %v333_v51  ;;  %v1210_v53 = vmul.f32 -1.442695, %v333_v51 }
 0x1dc   :  { %1515 = vpow2.f32 %v1210_v53 }
 0x1e4   :  { %v1514_v52 = vpop.eup %1513 }
 0x1e5   :  { %343 = vrot.lane.b32.xlu0 %v1514_v52, %s1609_s8 }
 0x1e6   :  { %v1516_v54 = vpop.eup %1515 }
 0x1e7   :  { %v337_v55 = vadd.f32 1.0, %v1516_v54 }
 0x1e9   :  { %1517 = vrcp.f32 %v337_v55 }
 0x1f3   :  { %v1518_v56 = vpop.eup %1517 }
 0x1f4   :  { %v341_v59 = vmul.f32 0.0, %v1518_v56 }
 0x257   :  { %v344_v57 = vpop.permute.xlu0 %343 }
 0x258   :  { %v346_v58 = vmul.f32 %v1518_v56, %v344_v57 }
 0x25a   :  { %348 = vrot.lane.b32.xlu1 %v346_v58, %s1610_s4 }
 0x2cc   :  { %v349_v60 = vpop.permute.xlu1 %348 }
 0x2cd   :  { %v351_v61 = vadd.f32 %v349_v60, %v341_v59  ;;  %v673_v60 = vld [vmem:[#allocation2 + $0x4] sm:$0x1] }
 0x2cf   :  { %1519 = vtanh.f32 %v351_v61 }
 0x2d9   :  { %v1520_v62 = vpop.eup %1519 }
 0x2da   :  { %354 = vrot.lane.b32.xlu1 %v1520_v62, %s1609_s8 }
 0x34c   :  { %v355_v63 = vpop.permute.xlu1 %354 }
 0x34d   :  { %v357_v0 = vmul.f32 %v1518_v56, %v355_v63 }
 0x34f   :  { %359 = vrot.lane.b32.xlu0 %v357_v0, %s1610_s4 }
 0x3c1   :  { %v360_v1 = vpop.permute.xlu0 %359 }
 0x3c2   :  { %363 = vst.msk [vmem:[#allocation3] sm:$0x1] %vm362_vm5, %v360_v1  ;;  %1357 = vmatmul.mubr.msk.f32.vlgmr.msra.gmra.mrb[4].mxu1 %vm38_vm1, %v360_v1 }
 0x3c3   :  { %1471 = vmatpush3.bf16.msra.mxu1 %v1723_v19  ;;  %1378 = vmatprep.mubr.msk.f32.mxu1 %vm1606_vm0, %v1607_v6 }
 0x3c4   :  { %1472 = vmatprep.subr.bf16.mxu1 %v1605_v3 }
 0x3c7   :  { %1474 = vmatpush3.bf16.msra.mxu1 %v1733_v22 }
 0x3c8   :  { %1481 = vmatprep.subr.bf16.mxu1 %v1605_v3 }
 0x495   :  { %v433_v4 = vpop.f32.mrb[4].mxu1 }
 0x496   :  { %v437_v5 = vadd.f32 %v433_v4, %v364_v2  ;;  %v1358_v7 = vpop.f32.mrb[5].mxu1 }
 0x498   :  { %1521 = vtanh.f32 %v437_v5  ;;  %v1212_v9 = vmul.f32 -1.442695, %v437_v5 }
 0x49a   :  { %1523 = vpow2.f32 %v1212_v9 }
 0x4a2   :  { %v1522_v8 = vpop.eup %1521 }
 0x4a3   :  { %447 = vrot.lane.b32.xlu1 %v1522_v8, %s1609_s8 }
 0x4a4   :  { %v1524_v10 = vpop.eup %1523 }
 0x4a5   :  { %v441_v11 = vadd.f32 1.0, %v1524_v10 }
 0x4a7   :  { %1525 = vrcp.f32 %v441_v11 }
 0x4b1   :  { %v1526_v12 = vpop.eup %1525 }
 0x4b2   :  { %v445_v15 = vmul.f32 %v1526_v12, %v351_v61 }
 0x515   :  { %v448_v13 = vpop.permute.xlu1 %447 }
 0x516   :  { %v450_v14 = vmul.f32 %v1526_v12, %v448_v13 }
 0x518   :  { %452 = vrot.lane.b32.xlu0 %v450_v14, %s1610_s4 }
 0x58a   :  { %v453_v16 = vpop.permute.xlu0 %452 }
 0x58b   :  { %v455_v17 = vadd.f32 %v453_v16, %v445_v15  ;;  %v776_v16 = vld [vmem:[#allocation2 + $0x5] sm:$0x1] }
 0x58d   :  { %1527 = vtanh.f32 %v455_v17 }
 0x597   :  { %v1528_v18 = vpop.eup %1527 }
 0x598   :  { %458 = vrot.lane.b32.xlu1 %v1528_v18, %s1609_s8 }
 0x60a   :  { %v459_v20 = vpop.permute.xlu1 %458 }
 0x60b   :  { %v461_v21 = vmul.f32 %v1526_v12, %v459_v20 }
 0x60d   :  { %463 = vrot.lane.b32.xlu0 %v461_v21, %s1610_s4 }
 0x67f   :  { %v464_v23 = vpop.permute.xlu0 %463 }
 0x680   :  { %466 = vst.msk [vmem:[#allocation3 + $0x1] sm:$0x1] %vm362_vm5, %v464_v23  ;;  %1368 = vmatmul.mubr.msk.f32.vlgmr.msra.gmra.mrb[14].mxu0 %vm38_vm1, %v464_v23 }
 0x681   :  { %1477 = vmatpush3.bf16.msra.mxu0 %v1723_v19  ;;  %1389 = vmatprep.mubr.msk.f32.mxu0 %vm1606_vm0, %v1607_v6 }
 0x682   :  { %1478 = vmatprep.subr.bf16.mxu0 %v1605_v3 }
 0x685   :  { %1480 = vmatpush3.bf16.msra.mxu0 %v1733_v22 }
 0x686   :  { %1487 = vmatprep.subr.bf16.mxu0 %v1605_v3 }
 0x753   :  { %v536_v25 = vpop.f32.mrb[14].mxu0 }
 0x754   :  { %v540_v26 = vadd.f32 %v536_v25, %v467_v24  ;;  %v1369_v27 = vpop.f32.mrb[15].mxu0 }
 0x756   :  { %1529 = vtanh.f32 %v540_v26  ;;  %v1214_v29 = vmul.f32 -1.442695, %v540_v26 }
 0x758   :  { %1531 = vpow2.f32 %v1214_v29 }
 0x760   :  { %v1530_v28 = vpop.eup %1529 }
 0x761   :  { %550 = vrot.lane.b32.xlu1 %v1530_v28, %s1609_s8 }
 0x762   :  { %v1532_v30 = vpop.eup %1531 }
 0x763   :  { %v544_v31 = vadd.f32 1.0, %v1532_v30 }
 0x765   :  { %1533 = vrcp.f32 %v544_v31 }
 0x76f   :  { %v1534_v32 = vpop.eup %1533 }
 0x770   :  { %v548_v35 = vmul.f32 %v1534_v32, %v455_v17 }
 0x7d3   :  { %v551_v33 = vpop.permute.xlu1 %550 }
 0x7d4   :  { %v553_v34 = vmul.f32 %v1534_v32, %v551_v33 }
 0x7d6   :  { %555 = vrot.lane.b32.xlu0 %v553_v34, %s1610_s4  ;;  %v879_v34 = vld [vmem:[#allocation2 + $0x6] sm:$0x1] }
 0x848   :  { %v556_v36 = vpop.permute.xlu0 %555 }
 0x849   :  { %v558_v37 = vadd.f32 %v556_v36, %v548_v35 }
 0x84b   :  { %1535 = vtanh.f32 %v558_v37 }
 0x855   :  { %v1536_v38 = vpop.eup %1535 }
 0x856   :  { %561 = vrot.lane.b32.xlu1 %v1536_v38, %s1609_s8 }
 0x8c8   :  { %v562_v39 = vpop.permute.xlu1 %561 }
 0x8c9   :  { %v564_v40 = vmul.f32 %v1534_v32, %v562_v39 }
 0x8cb   :  { %566 = vrot.lane.b32.xlu0 %v564_v40, %s1610_s4 }
 0x93d   :  { %v567_v41 = vpop.permute.xlu0 %566 }
 0x93e   :  { %569 = vst.msk [vmem:[#allocation3 + $0x2] sm:$0x1] %vm362_vm5, %v567_v41  ;;  %1379 = vmatmul.mubr.msk.f32.vlgmr.msra.gmra.mrb[6].mxu1 %vm38_vm1, %v567_v41 }
 0x93f   :  { %1483 = vmatpush3.bf16.msra.mxu1 %v1723_v19  ;;  %1400 = vmatprep.mubr.msk.f32.mxu1 %vm1606_vm0, %v1607_v6 }
 0x940   :  { %1484 = vmatprep.subr.bf16.mxu1 %v1605_v3 }
 0x943   :  { %1486 = vmatpush3.bf16.msra.mxu1 %v1733_v22 }
 0x944   :  { %1493 = vmatprep.subr.bf16.mxu1 %v1605_v3 }
 0xa11   :  { %v639_v43 = vpop.f32.mrb[6].mxu1 }
 0xa12   :  { %v643_v44 = vadd.f32 %v639_v43, %v570_v42  ;;  %v1380_v45 = vpop.f32.mrb[7].mxu1 }
 0xa14   :  { %1537 = vtanh.f32 %v643_v44  ;;  %v1216_v47 = vmul.f32 -1.442695, %v643_v44 }
 0xa16   :  { %1539 = vpow2.f32 %v1216_v47 }
 0xa1e   :  { %v1538_v46 = vpop.eup %1537 }
 0xa1f   :  { %653 = vrot.lane.b32.xlu1 %v1538_v46, %s1609_s8 }
 0xa20   :  { %v1540_v48 = vpop.eup %1539 }
 0xa21   :  { %v647_v49 = vadd.f32 1.0, %v1540_v48 }
 0xa23   :  { %1541 = vrcp.f32 %v647_v49 }
 0xa2d   :  { %v1542_v50 = vpop.eup %1541 }
 0xa2e   :  { %v651_v53 = vmul.f32 %v1542_v50, %v558_v37 }
 0xa91   :  { %v654_v51 = vpop.permute.xlu1 %653 }
 0xa92   :  { %v656_v52 = vmul.f32 %v1542_v50, %v654_v51  ;;  %v982_v51 = vld [vmem:[#allocation2 + $0x7] sm:$0x1] }
 0xa94   :  { %658 = vrot.lane.b32.xlu0 %v656_v52, %s1610_s4 }
 0xb06   :  { %v659_v54 = vpop.permute.xlu0 %658 }
 0xb07   :  { %v661_v55 = vadd.f32 %v659_v54, %v651_v53 }
 0xb09   :  { %1543 = vtanh.f32 %v661_v55 }
 0xb13   :  { %v1544_v56 = vpop.eup %1543 }
 0xb14   :  { %664 = vrot.lane.b32.xlu1 %v1544_v56, %s1609_s8 }
 0xb86   :  { %v665_v57 = vpop.permute.xlu1 %664 }
 0xb87   :  { %v667_v58 = vmul.f32 %v1542_v50, %v665_v57 }
 0xb89   :  { %669 = vrot.lane.b32.xlu0 %v667_v58, %s1610_s4 }
 0xbfb   :  { %v670_v59 = vpop.permute.xlu0 %669 }
 0xbfc   :  { %672 = vst.msk [vmem:[#allocation3 + $0x3] sm:$0x1] %vm362_vm5, %v670_v59  ;;  %1390 = vmatmul.mubr.msk.f32.vlgmr.msra.gmra.mrb[16].mxu0 %vm38_vm1, %v670_v59 }
 0xbfd   :  { %1489 = vmatpush3.bf16.msra.mxu0 %v1723_v19  ;;  %1411 = vmatprep.mubr.msk.f32.mxu0 %vm1606_vm0, %v1607_v6 }
 0xbfe   :  { %1490 = vmatprep.subr.bf16.mxu0 %v1605_v3 }
 0xc01   :  { %1492 = vmatpush3.bf16.msra.mxu0 %v1733_v22 }
 0xc02   :  { %1499 = vmatprep.subr.bf16.mxu0 %v1605_v3 }
 0xccf   :  { %v742_v61 = vpop.f32.mrb[16].mxu0 }
 0xcd0   :  { %v746_v62 = vadd.f32 %v742_v61, %v673_v60  ;;  %v1391_v63 = vpop.f32.mrb[17].mxu0 }
 0xcd2   :  { %1545 = vtanh.f32 %v746_v62  ;;  %v1218_v1 = vmul.f32 -1.442695, %v746_v62 }
 0xcd4   :  { %1547 = vpow2.f32 %v1218_v1 }
 0xcdc   :  { %v1546_v0 = vpop.eup %1545 }
 0xcdd   :  { %756 = vrot.lane.b32.xlu1 %v1546_v0, %s1609_s8 }
 0xcde   :  { %v1548_v2 = vpop.eup %1547 }
 0xcdf   :  { %v750_v4 = vadd.f32 1.0, %v1548_v2  ;;  %v1086_v2 = vld [vmem:[%s1873_s5] sm:$0xff] }
 0xce1   :  { %1549 = vrcp.f32 %v750_v4  ;;  %v1087_v4 = vld [vmem:[%s1873_s5 + $0x8] sm:$0xff] }
 0xceb   :  { %v1550_v5 = vpop.eup %1549 }
 0xcec   :  { %v754_v9 = vmul.f32 %v1550_v5, %v661_v55 }
 0xd4f   :  { %v757_v7 = vpop.permute.xlu1 %756 }
 0xd50   :  { %v759_v8 = vmul.f32 %v1550_v5, %v757_v7  ;;  %v1500_v7 = vpack.c.bf16 %v1087_v4, %v1086_v2 }
 0xd52   :  { %761 = vrot.lane.b32.xlu0 %v759_v8, %s1610_s4  ;;  %v1089_v8 = vld [vmem:[%s1873_s5 + $0x18] sm:$0xff] }
 0xdc4   :  { %v762_v10 = vpop.permute.xlu0 %761 }
 0xdc5   :  { %v764_v11 = vadd.f32 %v762_v10, %v754_v9 }
 0xdc7   :  { %1551 = vtanh.f32 %v764_v11 }
 0xdd1   :  { %v1552_v12 = vpop.eup %1551 }
 0xdd2   :  { %767 = vrot.lane.b32.xlu1 %v1552_v12, %s1609_s8 }
 0xe44   :  { %v768_v13 = vpop.permute.xlu1 %767 }
 0xe45   :  { %v770_v14 = vmul.f32 %v1550_v5, %v768_v13  ;;  %v1088_v5 = vld [vmem:[%s1873_s5 + $0x10] sm:$0xff]  ;;  %s1611_s5 = smov [#allocation4]  }
 0xe46   :  { %v1503_v9 = vpack.c.bf16 %v1089_v8, %v1088_v5 }
 0xe47   :  { %772 = vrot.lane.b32.xlu0 %v770_v14, %s1610_s4  ;;  %v1225_v14 = vld [vmem:[%s1874_s6] ss:$0 sm:$0xff]  ;;  %s1191_s6 = sshll.u32 %s1611_s5, 4  ;;  %s1192_s6 = int_to_ptr.vmem [resolvable:$true] %s1191_s6 }
 0xe48   :  { %s1581_s17 = scalar_lea.vmem %s1192_s6, 128  ;;  %p1586_p1 = scmp.lt.s32.totalorder %s1192_s6, %s1192_s6 }
 0xe49   :  { %p1582_p0 = scmp.ne.s32.totalorder %s1192_s6, %s1581_s17  ;;  %p1587_p2 = scmp.lt.s32.totalorder %s1581_s17, %s1581_s17 }
 0xe4b   :  { %p1588_p3 = por %p1587_p2, %p1586_p1 }
 0xe4d   :  { %p1589_p4 = pnand %p1588_p3, %p1582_p0 }
 0xeb9   :  { %v773_v15 = vpop.permute.xlu0 %772 }
 0xeba   :  { %775 = vst.msk [vmem:[#allocation3 + $0x4] sm:$0x1] %vm362_vm5, %v773_v15  ;;  %1401 = vmatmul.mubr.msk.f32.vlgmr.msra.gmra.mrb[8].mxu1 %vm38_vm1, %v773_v15 }
 0xebb   :  { %1495 = vmatpush3.bf16.msra.mxu1 %v1723_v19  ;;  %1422 = vmatprep.mubr.msk.f32.mxu1 %vm1606_vm0, %v1607_v6 }
 0xebc   :  { %1496 = vmatprep.subr.bf16.mxu1 %v1605_v3 }
 0xebf   :  { %1498 = vmatpush3.bf16.msra.mxu1 %v1733_v22 }
 0xf8d   :  { %v845_v17 = vpop.f32.mrb[8].mxu1 }
 0xf8e   :  { %v849_v18 = vadd.f32 %v845_v17, %v776_v16  ;;  %v1402_v20 = vpop.f32.mrb[9].mxu1 }
 0xf90   :  { %1553 = vtanh.f32 %v849_v18  ;;  %v1220_v23 = vmul.f32 -1.442695, %v849_v18 }
 0xf92   :  { %1555 = vpow2.f32 %v1220_v23 }
 0xf9a   :  { %v1554_v21 = vpop.eup %1553 }
 0xf9b   :  { %859 = vrot.lane.b32.xlu1 %v1554_v21, %s1609_s8 }
 0xf9c   :  { %v1556_v24 = vpop.eup %1555 }
 0xf9d   :  { %v853_v25 = vadd.f32 1.0, %v1556_v24 }
 0xf9f   :  { %1557 = vrcp.f32 %v853_v25 }
 0xfa9   :  { %v1558_v19 = vpop.eup %1557 }
 0xfaa   :  { %v857_v28 = vmul.f32 %v1558_v19, %v764_v11 }
0x100d   :  { %v860_v26 = vpop.permute.xlu1 %859 }
0x100e   :  { %v862_v27 = vmul.f32 %v1558_v19, %v860_v26 }
0x1010   :  { %864 = vrot.lane.b32.xlu0 %v862_v27, %s1610_s4 }
0x1082   :  { %v865_v22 = vpop.permute.xlu0 %864 }
0x1083   :  { %v867_v29 = vadd.f32 %v865_v22, %v857_v28 }
0x1085   :  { %1559 = vtanh.f32 %v867_v29 }
0x108f   :  { %v1560_v30 = vpop.eup %1559 }
0x1090   :  { %870 = vrot.lane.b32.xlu1 %v1560_v30, %s1609_s8 }
0x1102   :  { %v871_v31 = vpop.permute.xlu1 %870 }
0x1103   :  { %v873_v32 = vmul.f32 %v1558_v19, %v871_v31 }
0x1105   :  { %875 = vrot.lane.b32.xlu0 %v873_v32, %s1610_s4 }
0x1177   :  { %v876_v33 = vpop.permute.xlu0 %875 }
0x1178   :  { %878 = vst.msk [vmem:[#allocation3 + $0x5] sm:$0x1] %vm362_vm5, %v876_v33  ;;  %1412 = vmatmul.mubr.msk.f32.vlgmr.msra.gmra.mrb[18].mxu0 %vm38_vm1, %v876_v33 }
0x1179   :  { %1433 = vmatprep.mubr.msk.f32.mxu0 %vm1606_vm0, %v1607_v6  ;;  %1501 = vmatpush3.bf16.msra.mxu0 %v1500_v7 }
0x117a   :  { %1502 = vmatprep.subr.bf16.mxu0 %v1605_v3 }
0x117d   :  { %1504 = vmatpush3.bf16.msra.mxu0 %v1503_v9 }
0x124b   :  { %v948_v35 = vpop.f32.mrb[18].mxu0 }
0x124c   :  { %v952_v36 = vadd.f32 %v948_v35, %v879_v34  ;;  %v1413_v37 = vpop.f32.mrb[19].mxu0 }
0x124e   :  { %1561 = vtanh.f32 %v952_v36  ;;  %v1222_v39 = vmul.f32 -1.442695, %v952_v36 }
0x1250   :  { %1563 = vpow2.f32 %v1222_v39 }
0x1258   :  { %v1562_v38 = vpop.eup %1561 }
0x1259   :  { %962 = vrot.lane.b32.xlu1 %v1562_v38, %s1609_s8 }
0x125a   :  { %v1564_v40 = vpop.eup %1563 }
0x125b   :  { %v956_v41 = vadd.f32 1.0, %v1564_v40 }
0x125d   :  { %1565 = vrcp.f32 %v956_v41 }
0x1267   :  { %v1566_v42 = vpop.eup %1565 }
0x1268   :  { %v960_v45 = vmul.f32 %v1566_v42, %v867_v29 }
0x12cb   :  { %v963_v43 = vpop.permute.xlu1 %962 }
0x12cc   :  { %v965_v44 = vmul.f32 %v1566_v42, %v963_v43 }
0x12ce   :  { %967 = vrot.lane.b32.xlu0 %v965_v44, %s1610_s4 }
0x1340   :  { %v968_v6 = vpop.permute.xlu0 %967 }
0x1341   :  { %v970_v46 = vadd.f32 %v968_v6, %v960_v45 }
0x1343   :  { %1567 = vtanh.f32 %v970_v46 }
0x134d   :  { %v1568_v47 = vpop.eup %1567 }
0x134e   :  { %973 = vrot.lane.b32.xlu1 %v1568_v47, %s1609_s8 }
0x13c0   :  { %v974_v48 = vpop.permute.xlu1 %973 }
0x13c1   :  { %v976_v49 = vmul.f32 %v1566_v42, %v974_v48 }
0x13c3   :  { %978 = vrot.lane.b32.xlu0 %v976_v49, %s1610_s4 }
0x1435   :  { %v979_v50 = vpop.permute.xlu0 %978 }
0x1436   :  { %981 = vst.msk [vmem:[#allocation3 + $0x6] sm:$0x1] %vm362_vm5, %v979_v50  ;;  %1423 = vmatmul.mubr.msk.f32.vlgmr.msra.gmra.mrb[10].mxu1 %vm38_vm1, %v979_v50 }
0x1509   :  { %v1051_v52 = vpop.f32.mrb[10].mxu1 }
0x150a   :  { %v1055_v53 = vadd.f32 %v1051_v52, %v982_v51  ;;  %v1424_v54 = vpop.f32.mrb[11].mxu1 }
0x150c   :  { %1569 = vtanh.f32 %v1055_v53  ;;  %v1224_v56 = vmul.f32 -1.442695, %v1055_v53 }
0x150e   :  { %1571 = vpow2.f32 %v1224_v56 }
0x1516   :  { %v1570_v55 = vpop.eup %1569 }
0x1517   :  { %1065 = vrot.lane.b32.xlu1 %v1570_v55, %s1609_s8 }
0x1518   :  { %v1572_v57 = vpop.eup %1571 }
0x1519   :  { %v1059_v58 = vadd.f32 1.0, %v1572_v57 }
0x151b   :  { %1573 = vrcp.f32 %v1059_v58 }
0x1525   :  { %v1574_v59 = vpop.eup %1573 }
0x1526   :  { %v1063_v62 = vmul.f32 %v1574_v59, %v970_v46 }
0x1589   :  { %v1066_v60 = vpop.permute.xlu1 %1065 }
0x158a   :  { %v1068_v61 = vmul.f32 %v1574_v59, %v1066_v60 }
0x158c   :  { %1070 = vrot.lane.b32.xlu0 %v1068_v61, %s1610_s4 }
0x15fe   :  { %v1071_v63 = vpop.permute.xlu0 %1070 }
0x15ff   :  { %v1073_v0 = vadd.f32 %v1071_v63, %v1063_v62 }
0x1601   :  { %1575 = vtanh.f32 %v1073_v0 }
0x160b   :  { %v1576_v1 = vpop.eup %1575 }
0x160c   :  { %1076 = vrot.lane.b32.xlu1 %v1576_v1, %s1609_s8 }
0x167e   :  { %v1077_v10 = vpop.permute.xlu1 %1076 }
0x167f   :  { %v1079_v11 = vmul.f32 %v1574_v59, %v1077_v10 }
0x1681   :  { %1081 = vrot.lane.b32.xlu0 %v1079_v11, %s1610_s4 }
0x16f3   :  { %v1082_v12 = vpop.permute.xlu0 %1081 }
0x16f4   :  { %1084 = vst.msk [vmem:[#allocation3 + $0x7] sm:$0x1] %vm362_vm5, %v1082_v12 }
0x16fb   :  { %v1085_v13 = vld [vmem:[#allocation3] sm:$0xff] }
0x16fc   :  { %1434 = vmatmul.mubr.msk.f32.vlgmr.msra.gmra.mrb[20].mxu0 %vm38_vm1, %v1085_v13 }
0x17cf   :  { %v1166_v15 = vpop.f32.mrb[20].mxu0 }
0x17d0   :  { %v1167_v16 = vadd.f32 %v1225_v14, %v1166_v15  ;;  %v1435_v17 = vpop.f32.mrb[21].mxu0 }
0x17d2   :  { %v1171_v3 = vsel %vm1170_vm6, %v1167_v16, -inf }
0x17d3   :  { %1172 = vmax.xlane.f32.xlu1 %v1171_v3 }
0x1860   :  { %v1173_v18 = vpop.xlane.xlu1 %1172 }
0x1861   :  { %v1174_v20 = vsub.f32 %v1167_v16, %v1173_v18 }
0x1863   :  { %v1175_v21 = vmul.f32 1.442695, %v1174_v20 }
0x1865   :  { %1577 = vpow2.f32 %v1175_v21 }
0x186f   :  { %v1578_v23 = vpop.eup %1577 }
0x1870   :  { %v1177_v24 = vsel %vm1170_vm6, %v1578_v23, 0.0 }
0x1871   :  { %1178 = vadd.xlane.f32.xlu0 %v1177_v24 }
0x18fe   :  { %v1179_v25 = vpop.xlane.xlu0 %1178 }
0x18ff   :  { %1579 = vlog2.f32 %v1179_v25 }
0x1909   :  { %v1580_v19 = vpop.eup %1579 }
0x190a   :  { %v1181_v26 = vmul.f32 0.6931472, %v1580_v19 }
0x190c   :  { %v1182_v27 = vadd.f32 %v1181_v26, %v1173_v18 }
0x190e   :  { %v1183_v28 = vsub.f32 %v1167_v16, %v1182_v27 }
0x1910   :  { %1184 = vst.msk [vmem:[#allocation4] sm:$0xff] %vm1170_vm6, %v1183_v28 }
0x1911   :  { %1592 = shalt.err (!%p1589_p4)
}
0x1912   :  { %s1593_s20 = scalar_lea.hbm %s1875_s7, 128 }
0x1913   :  { %p1594_p5 = scmp.ne.s32.totalorder %s1875_s7, %s1593_s20  ;;  %p1597_p6 = scmp.lt.u32.totalorder %s1593_s20, %s1875_s7 }
0x1915   :  { %p1599_p7 = pnand %p1597_p6, %p1594_p5 }
0x1917   :  { %1602 = shalt.err (!%p1599_p7)
}
0x1918   :  { %1194 = dma.vmem_to_hbm [thread:$0]  %s1192_s6, 128, %s1875_s7, [#allocation5]  }
0x1919   :  { %1603 = dma.done.wait [#allocation5], 128  }
0x191a   :  { %1604 = vsyncadd [#allocation5], 4294967168 }
0x191b   :  { %1198 = vsyncpa [#allocation5], 1 }

</bundles_post_ra>
